<compile_context>
chip_gen: v7x
topology: tpu7x:2x2x1
jax: 0.10.0
libtpu: 0.0.40
codegen_flags: <defaults>
</compile_context>

<pallas_src>
import functools

import jax
import jax.numpy as jnp
from jax.experimental import pallas as pl
from jax.experimental.pallas import tpu as pltpu


def _patch_merging_kernel(x_ref, gamma_ref, beta_ref, w_ref, o_ref, *, wp2, c, eps):
    """Fused 2x2 gather + LayerNorm(4C) + Linear(4C->2C) for P image-row pairs.

    x_ref:     (P, 2*Wp*C)    row r = one pair of image rows [row 2r | row 2r+1]
    gamma_ref: (1, 4C)        LN scale, channel-permuted to [x0, x2, x1, x3]
    beta_ref:  (1, 4C)        LN shift, same permutation
    w_ref:     (4C, 2C)       reduction weight (pre-transposed, rows permuted)
    o_ref:     (P, (Wp/2)*2C) row-major identical to (P*Wp/2 tokens, 2C)
    """
    c2 = 2 * c                         # token half-width == output width (2C)
    half = wp2 * c2                    # lane offset of the bottom image row (= Wp*C)
    g = gamma_ref[...].astype(jnp.float32)
    b = beta_ref[...].astype(jnp.float32)
    w = w_ref[...]

    for j in range(wp2):               # static unroll over column pairs
        lo = j * c2
        top = x_ref[:, lo:lo + c2]                        # (P, 2C) = [x0 | x2]
        bot = x_ref[:, half + lo:half + lo + c2]          # (P, 2C) = [x1 | x3]
        tok = jnp.concatenate([top, bot], axis=-1).astype(jnp.float32)  # (P, 4C)

        # LayerNorm over the 4C channels (biased variance, == nn.LayerNorm).
        mean = jnp.mean(tok, axis=-1, keepdims=True)
        ctr = tok - mean
        var = jnp.mean(ctr * ctr, axis=-1, keepdims=True)
        inv = jax.lax.rsqrt(var + eps)                    # EUP slot
        xn = ctr * inv * g + b                            # (P, 4C)

        # Linear(4C -> 2C, bias=False); f32 accumulation on the MXU.
        y = jnp.dot(xn.astype(w.dtype), w, preferred_element_type=jnp.float32)
        o_ref[:, lo:lo + c2] = y.astype(o_ref.dtype)      # token j's 2C lanes


def patch_merging_forward(x, H, W, gamma, beta, w_t, *, eps=1e-5, target_tokens=1024):
    """x: (B, H*W, C); gamma/beta: (4C,); w_t: (4C, 2C) (nn.Linear weight pre-transposed).

    Returns (B, ceil(H/2)*ceil(W/2), 2C).
    """
    B, L, C = x.shape
    assert L == H * W, "input feature has wrong size"
    C2, C4 = 2 * C, 4 * C

    Hp, Wp = H + (H % 2), W + (W % 2)
    if (Hp, Wp) != (H, W):
        # Rare odd-size path: pays one extra HBM copy for the zero pad.
        # TODO(synk): fold the zero-pad into the kernel with a masked tail row/col.
        xr = jnp.pad(x.reshape(B, H, W, C),
                     ((0, 0), (0, Hp - H), (0, Wp - W), (0, 0)))
    else:
        xr = x
    hp2, wp2 = Hp // 2, Wp // 2
    n_pairs = B * hp2                      # total image-row pairs (= output slab rows)
    row_elems = 2 * Wp * C                 # one pair of image rows, contiguous
    xv = xr.reshape(n_pairs, row_elems)    # free, contiguous view (no data movement)

    # Row pairs per grid step: aim for ~target_tokens merged tokens per step,
    # cap the input block at ~4 MiB, round to the sublane packing of the dtype.
    itemsize = jnp.dtype(x.dtype).itemsize
    p = max(1, target_tokens // max(1, wp2))
    p = min(p, max(1, (4 << 20) // (row_elems * itemsize)))
    sub = {4: 8, 2: 16, 1: 32}.get(itemsize, 8)
    if p >= n_pairs:
        p = n_pairs                        # full-extent block (any size allowed)
        grid = 1
    else:
        p = max(sub, (p // sub) * sub)
        grid = pl.cdiv(n_pairs, p)         # partial last block handled by Pallas

    # The in-kernel gather produces channel order [x0, x2, x1, x3]; absorb that
    # permutation into the LN affine params and the weight rows (tiny host-side op).
    def perm(a):
        return jnp.concatenate([a[0:C], a[2 * C:3 * C], a[C:2 * C], a[3 * C:4 * C]], axis=0)

    gamma_p = perm(gamma).reshape(1, C4)
    beta_p = perm(beta).reshape(1, C4)
    w_p = perm(w_t)                        # (4C, 2C)

    out_row = wp2 * C2                     # lane-dense output row per image-row pair
    kernel = functools.partial(_patch_merging_kernel, wp2=wp2, c=C, eps=eps)

    # Explicit VMEM budget: double-buffered in/out blocks + resident constants,
    # with headroom; clamped to stay within v7x's smaller physical VMEM.
    in_block = p * row_elems * itemsize
    out_block = p * out_row * itemsize
    const_b = w_p.size * jnp.dtype(w_p.dtype).itemsize + 2 * C4 * 4
    vmem_limit = int(min(48 << 20,
                         max(16 << 20, 3 * (in_block + out_block) + 2 * const_b + (2 << 20))))

    out = pl.pallas_call(
        kernel,
        out_shape=jax.ShapeDtypeStruct((n_pairs, out_row), x.dtype),
        grid=(grid,),
        in_specs=[
            pl.BlockSpec((p, row_elems), lambda i: (i, 0)),   # P row pairs / step
            pl.BlockSpec((1, C4), lambda i: (0, 0)),          # gamma (resident)
            pl.BlockSpec((1, C4), lambda i: (0, 0)),          # beta  (resident)
            pl.BlockSpec((C4, C2), lambda i: (0, 0)),         # reduction weight
        ],
        out_specs=pl.BlockSpec((p, out_row), lambda i: (i, 0)),
        compiler_params=pltpu.CompilerParams(
            dimension_semantics=("parallel",),                # independent steps
            vmem_limit_bytes=vmem_limit,
        ),
    )(xv, gamma_p, beta_p, w_p)

    L2 = hp2 * wp2
    # (n_pairs, wp2*2C) is row-major identical to (n_pairs*wp2 tokens, 2C).
    return out.reshape(B * L2, C2).reshape(B, L2, C2)


def reference_patch_merging(x, H, W, gamma, beta, w_t, eps=1e-5):
    """Pure-JAX port of the PyTorch forward for correctness checking."""
    B, L, C = x.shape
    xr = x.reshape(B, H, W, C)
    Hp, Wp = H + (H % 2), W + (W % 2)
    xr = jnp.pad(xr, ((0, 0), (0, Hp - H), (0, Wp - W), (0, 0)))
    x0 = xr[:, 0::2, 0::2, :]
    x1 = xr[:, 1::2, 0::2, :]
    x2 = xr[:, 0::2, 1::2, :]
    x3 = xr[:, 1::2, 1::2, :]
    xm = jnp.concatenate([x0, x1, x2, x3], axis=-1).reshape(B, -1, 4 * C)
    mu = xm.mean(-1, keepdims=True)
    var = ((xm - mu) ** 2).mean(-1, keepdims=True)
    xn = (xm - mu) / jnp.sqrt(var + eps)
    xn = xn * gamma + beta
    return xn @ w_t


if __name__ == "__main__":
    key = jax.random.PRNGKey(0)
    kx, kg, kb, kw, kx2, kx3 = jax.random.split(key, 6)

    # dim=32 -> LayerNorm(128), Linear(128 -> 64).
    B, H, W, C = 2, 16, 16, 32
    x = jax.random.normal(kx, (B, H * W, C), dtype=jnp.float32)
    gamma = 1.0 + 0.1 * jax.random.normal(kg, (4 * C,), dtype=jnp.float32)
    beta = 0.1 * jax.random.normal(kb, (4 * C,), dtype=jnp.float32)
    # nn.Linear(4C, 2C, bias=False).weight is (2C, 4C); pass it pre-transposed (4C, 2C).
    w_t = 0.05 * jax.random.normal(kw, (4 * C, 2 * C), dtype=jnp.float32)

    # Case 1: even spatial dims (zero-copy gather path).
    y = patch_merging_forward(x, H, W, gamma, beta, w_t)
    jax.block_until_ready(y)
    y_ref = reference_patch_merging(x, H, W, gamma, beta, w_t)
    assert y.shape == (B, (H // 2) * (W // 2), 2 * C)
    assert jnp.allclose(y, y_ref, atol=1e-4, rtol=1e-4)

    # Case 2: odd spatial dims (exercises the zero-pad path).
    H2, W2 = 15, 13
    x2 = jax.random.normal(kx2, (B, H2 * W2, C), dtype=jnp.float32)
    y2 = patch_merging_forward(x2, H2, W2, gamma, beta, w_t)
    jax.block_until_ready(y2)
    y2_ref = reference_patch_merging(x2, H2, W2, gamma, beta, w_t)
    assert y2.shape == (B, ((H2 + 1) // 2) * ((W2 + 1) // 2), 2 * C)
    assert jnp.allclose(y2, y2_ref, atol=1e-4, rtol=1e-4)

    # Case 3: enough rows for a multi-step grid with a partial last block.
    B3, H3, W3 = 1, 270, 16
    x3 = jax.random.normal(kx3, (B3, H3 * W3, C), dtype=jnp.float32)
    y3 = patch_merging_forward(x3, H3, W3, gamma, beta, w_t)
    jax.block_until_ready(y3)
    y3_ref = reference_patch_merging(x3, H3, W3, gamma, beta, w_t)
    assert y3.shape == (B3, (H3 // 2) * (W3 // 2), 2 * C)
    assert jnp.allclose(y3, y3_ref, atol=1e-4, rtol=1e-4)

    print("KERNEL_OK")
</pallas_src>

<mosaic_0001>
module attributes {stable_mosaic.version = 11 : i64} {
  func.func @_patch_merging_kernel(%arg0: i32, %arg1: memref<16x1024xf32, #tpu.memory_space<vmem>>, %arg2: memref<1x128xf32, #tpu.memory_space<vmem>>, %arg3: memref<1x128xf32, #tpu.memory_space<vmem>>, %arg4: memref<128x64xf32, #tpu.memory_space<vmem>>, %arg5: memref<16x512xf32, #tpu.memory_space<vmem>>) attributes {dimension_semantics = [#tpu.dimension_semantics<parallel>], iteration_bounds = array<i64: 1>, scalar_prefetch = 0 : i64, scratch_operands = 0 : i64, tpu.core_type = #tpu.core_type<tc>, window_params = [{transform_indices = @transform_0, window_bounds = array<i64: 16, 1024>}, {pipeline_mode = #tpu.pipeline_mode<synchronous>, transform_indices = @transform_1, window_bounds = array<i64: 1, 128>}, {pipeline_mode = #tpu.pipeline_mode<synchronous>, transform_indices = @transform_2, window_bounds = array<i64: 1, 128>}, {pipeline_mode = #tpu.pipeline_mode<synchronous>, transform_indices = @transform_3, window_bounds = array<i64: 128, 64>}, {transform_indices = @transform_4, window_bounds = array<i64: 16, 512>}]} {
    %c0 = arith.constant 0 : index
    %c0_0 = arith.constant 0 : index
    %0 = vector.load %arg2[%c0, %c0_0] : memref<1x128xf32, #tpu.memory_space<vmem>>, vector<1x128xf32>
    %c0_1 = arith.constant 0 : index
    %c0_2 = arith.constant 0 : index
    %1 = vector.load %arg3[%c0_1, %c0_2] : memref<1x128xf32, #tpu.memory_space<vmem>>, vector<1x128xf32>
    %c0_3 = arith.constant 0 : index
    %c0_4 = arith.constant 0 : index
    %2 = vector.load %arg4[%c0_3, %c0_4] : memref<128x64xf32, #tpu.memory_space<vmem>>, vector<128x64xf32>
    %c0_5 = arith.constant 0 : index
    %c0_6 = arith.constant 0 : index
    %3 = vector.load %arg1[%c0_5, %c0_6] : memref<16x1024xf32, #tpu.memory_space<vmem>>, vector<16x64xf32>
    %c0_7 = arith.constant 0 : index
    %c512 = arith.constant 512 : index
    %4 = vector.load %arg1[%c0_7, %c512] : memref<16x1024xf32, #tpu.memory_space<vmem>>, vector<16x64xf32>
    %5 = tpu.concatenate %3, %4 in 1 : vector<16x64xf32>, vector<16x64xf32> -> vector<16x128xf32>
    %cst = arith.constant dense<0.000000e+00> : vector<16xf32>
    %6 = vector.multi_reduction <add>, %5, %cst [1] : vector<16x128xf32> to vector<16xf32>
    %7 = vector.shape_cast %6 : vector<16xf32> to vector<16x1xf32>
    %cst_8 = arith.constant 1.280000e+02 : f32
    %8 = vector.broadcast %cst_8 : f32 to vector<16x1xf32>
    %9 = arith.divf %7, %8 : vector<16x1xf32>
    %10 = vector.broadcast %9 : vector<16x1xf32> to vector<16x128xf32>
    %11 = arith.subf %5, %10 : vector<16x128xf32>
    %12 = arith.mulf %11, %11 : vector<16x128xf32>
    %cst_9 = arith.constant dense<0.000000e+00> : vector<16xf32>
    %13 = vector.multi_reduction <add>, %12, %cst_9 [1] : vector<16x128xf32> to vector<16xf32>
    %14 = vector.shape_cast %13 : vector<16xf32> to vector<16x1xf32>
    %cst_10 = arith.constant 1.280000e+02 : f32
    %15 = vector.broadcast %cst_10 : f32 to vector<16x1xf32>
    %16 = arith.divf %14, %15 : vector<16x1xf32>
    %cst_11 = arith.constant 9.99999974E-6 : f32
    %17 = vector.broadcast %cst_11 : f32 to vector<16x1xf32>
    %18 = arith.addf %16, %17 : vector<16x1xf32>
    %19 = math.rsqrt %18 : vector<16x1xf32>
    %20 = vector.broadcast %19 : vector<16x1xf32> to vector<16x128xf32>
    %21 = arith.mulf %11, %20 : vector<16x128xf32>
    %22 = vector.broadcast %0 : vector<1x128xf32> to vector<16x128xf32>
    %23 = arith.mulf %21, %22 : vector<16x128xf32>
    %24 = vector.broadcast %1 : vector<1x128xf32> to vector<16x128xf32>
    %25 = arith.addf %23, %24 : vector<16x128xf32>
    %cst_12 = arith.constant dense<0.000000e+00> : vector<16x64xf32>
    %26 = tpu.matmul %25, %2, %cst_12 {dimension_numbers = #tpu.dot_dimension_numbers<[1], [0], [0], [1], [0, 0, 1, 1], [], []>} : vector<16x128xf32>, vector<128x64xf32>, vector<16x64xf32> -> vector<16x64xf32>
    %c0_13 = arith.constant 0 : index
    %c0_14 = arith.constant 0 : index
    %27 = vector.load %arg5[%c0_13, %c0_14] : memref<16x512xf32, #tpu.memory_space<vmem>>, vector<16x64xf32>
    tpu.vector_store %arg5[%c0_13, %c0_14], %26 {strides = array<i32>} : memref<16x512xf32, #tpu.memory_space<vmem>>, vector<16x64xf32>,
    %c0_15 = arith.constant 0 : index
    %c64 = arith.constant 64 : index
    %28 = vector.load %arg1[%c0_15, %c64] : memref<16x1024xf32, #tpu.memory_space<vmem>>, vector<16x64xf32>
    %c0_16 = arith.constant 0 : index
    %c576 = arith.constant 576 : index
    %29 = vector.load %arg1[%c0_16, %c576] : memref<16x1024xf32, #tpu.memory_space<vmem>>, vector<16x64xf32>
    %30 = tpu.concatenate %28, %29 in 1 : vector<16x64xf32>, vector<16x64xf32> -> vector<16x128xf32>
    %cst_17 = arith.constant dense<0.000000e+00> : vector<16xf32>
    %31 = vector.multi_reduction <add>, %30, %cst_17 [1] : vector<16x128xf32> to vector<16xf32>
    %32 = vector.shape_cast %31 : vector<16xf32> to vector<16x1xf32>
    %cst_18 = arith.constant 1.280000e+02 : f32
    %33 = vector.broadcast %cst_18 : f32 to vector<16x1xf32>
    %34 = arith.divf %32, %33 : vector<16x1xf32>
    %35 = vector.broadcast %34 : vector<16x1xf32> to vector<16x128xf32>
    %36 = arith.subf %30, %35 : vector<16x128xf32>
    %37 = arith.mulf %36, %36 : vector<16x128xf32>
    %cst_19 = arith.constant dense<0.000000e+00> : vector<16xf32>
    %38 = vector.multi_reduction <add>, %37, %cst_19 [1] : vector<16x128xf32> to vector<16xf32>
    %39 = vector.shape_cast %38 : vector<16xf32> to vector<16x1xf32>
    %cst_20 = arith.constant 1.280000e+02 : f32
    %40 = vector.broadcast %cst_20 : f32 to vector<16x1xf32>
    %41 = arith.divf %39, %40 : vector<16x1xf32>
    %cst_21 = arith.constant 9.99999974E-6 : f32
    %42 = vector.broadcast %cst_21 : f32 to vector<16x1xf32>
    %43 = arith.addf %41, %42 : vector<16x1xf32>
    %44 = math.rsqrt %43 : vector<16x1xf32>
    %45 = vector.broadcast %44 : vector<16x1xf32> to vector<16x128xf32>
    %46 = arith.mulf %36, %45 : vector<16x128xf32>
    %47 = vector.broadcast %0 : vector<1x128xf32> to vector<16x128xf32>
    %48 = arith.mulf %46, %47 : vector<16x128xf32>
    %49 = vector.broadcast %1 : vector<1x128xf32> to vector<16x128xf32>
    %50 = arith.addf %48, %49 : vector<16x128xf32>
    %cst_22 = arith.constant dense<0.000000e+00> : vector<16x64xf32>
    %51 = tpu.matmul %50, %2, %cst_22 {dimension_numbers = #tpu.dot_dimension_numbers<[1], [0], [0], [1], [0, 0, 1, 1], [], []>} : vector<16x128xf32>, vector<128x64xf32>, vector<16x64xf32> -> vector<16x64xf32>
    %c0_23 = arith.constant 0 : index
    %c64_24 = arith.constant 64 : index
    %52 = vector.load %arg5[%c0_23, %c64_24] : memref<16x512xf32, #tpu.memory_space<vmem>>, vector<16x64xf32>
    tpu.vector_store %arg5[%c0_23, %c64_24], %51 {strides = array<i32>} : memref<16x512xf32, #tpu.memory_space<vmem>>, vector<16x64xf32>,
    %c0_25 = arith.constant 0 : index
    %c128 = arith.constant 128 : index
    %53 = vector.load %arg1[%c0_25, %c128] : memref<16x1024xf32, #tpu.memory_space<vmem>>, vector<16x64xf32>
    %c0_26 = arith.constant 0 : index
    %c640 = arith.constant 640 : index
    %54 = vector.load %arg1[%c0_26, %c640] : memref<16x1024xf32, #tpu.memory_space<vmem>>, vector<16x64xf32>
    %55 = tpu.concatenate %53, %54 in 1 : vector<16x64xf32>, vector<16x64xf32> -> vector<16x128xf32>
    %cst_27 = arith.constant dense<0.000000e+00> : vector<16xf32>
    %56 = vector.multi_reduction <add>, %55, %cst_27 [1] : vector<16x128xf32> to vector<16xf32>
    %57 = vector.shape_cast %56 : vector<16xf32> to vector<16x1xf32>
    %cst_28 = arith.constant 1.280000e+02 : f32
    %58 = vector.broadcast %cst_28 : f32 to vector<16x1xf32>
    %59 = arith.divf %57, %58 : vector<16x1xf32>
    %60 = vector.broadcast %59 : vector<16x1xf32> to vector<16x128xf32>
    %61 = arith.subf %55, %60 : vector<16x128xf32>
    %62 = arith.mulf %61, %61 : vector<16x128xf32>
    %cst_29 = arith.constant dense<0.000000e+00> : vector<16xf32>
    %63 = vector.multi_reduction <add>, %62, %cst_29 [1] : vector<16x128xf32> to vector<16xf32>
    %64 = vector.shape_cast %63 : vector<16xf32> to vector<16x1xf32>
    %cst_30 = arith.constant 1.280000e+02 : f32
    %65 = vector.broadcast %cst_30 : f32 to vector<16x1xf32>
    %66 = arith.divf %64, %65 : vector<16x1xf32>
    %cst_31 = arith.constant 9.99999974E-6 : f32
    %67 = vector.broadcast %cst_31 : f32 to vector<16x1xf32>
    %68 = arith.addf %66, %67 : vector<16x1xf32>
    %69 = math.rsqrt %68 : vector<16x1xf32>
    %70 = vector.broadcast %69 : vector<16x1xf32> to vector<16x128xf32>
    %71 = arith.mulf %61, %70 : vector<16x128xf32>
    %72 = vector.broadcast %0 : vector<1x128xf32> to vector<16x128xf32>
    %73 = arith.mulf %71, %72 : vector<16x128xf32>
    %74 = vector.broadcast %1 : vector<1x128xf32> to vector<16x128xf32>
    %75 = arith.addf %73, %74 : vector<16x128xf32>
    %cst_32 = arith.constant dense<0.000000e+00> : vector<16x64xf32>
    %76 = tpu.matmul %75, %2, %cst_32 {dimension_numbers = #tpu.dot_dimension_numbers<[1], [0], [0], [1], [0, 0, 1, 1], [], []>} : vector<16x128xf32>, vector<128x64xf32>, vector<16x64xf32> -> vector<16x64xf32>
    %c0_33 = arith.constant 0 : index
    %c128_34 = arith.constant 128 : index
    %77 = vector.load %arg5[%c0_33, %c128_34] : memref<16x512xf32, #tpu.memory_space<vmem>>, vector<16x64xf32>
    tpu.vector_store %arg5[%c0_33, %c128_34], %76 {strides = array<i32>} : memref<16x512xf32, #tpu.memory_space<vmem>>, vector<16x64xf32>,
    %c0_35 = arith.constant 0 : index
    %c192 = arith.constant 192 : index
    %78 = vector.load %arg1[%c0_35, %c192] : memref<16x1024xf32, #tpu.memory_space<vmem>>, vector<16x64xf32>
    %c0_36 = arith.constant 0 : index
    %c704 = arith.constant 704 : index
    %79 = vector.load %arg1[%c0_36, %c704] : memref<16x1024xf32, #tpu.memory_space<vmem>>, vector<16x64xf32>
    %80 = tpu.concatenate %78, %79 in 1 : vector<16x64xf32>, vector<16x64xf32> -> vector<16x128xf32>
    %cst_37 = arith.constant dense<0.000000e+00> : vector<16xf32>
    %81 = vector.multi_reduction <add>, %80, %cst_37 [1] : vector<16x128xf32> to vector<16xf32>
    %82 = vector.shape_cast %81 : vector<16xf32> to vector<16x1xf32>
    %cst_38 = arith.constant 1.280000e+02 : f32
    %83 = vector.broadcast %cst_38 : f32 to vector<16x1xf32>
    %84 = arith.divf %82, %83 : vector<16x1xf32>
    %85 = vector.broadcast %84 : vector<16x1xf32> to vector<16x128xf32>
    %86 = arith.subf %80, %85 : vector<16x128xf32>
    %87 = arith.mulf %86, %86 : vector<16x128xf32>
    %cst_39 = arith.constant dense<0.000000e+00> : vector<16xf32>
    %88 = vector.multi_reduction <add>, %87, %cst_39 [1] : vector<16x128xf32> to vector<16xf32>
    %89 = vector.shape_cast %88 : vector<16xf32> to vector<16x1xf32>
    %cst_40 = arith.constant 1.280000e+02 : f32
    %90 = vector.broadcast %cst_40 : f32 to vector<16x1xf32>
    %91 = arith.divf %89, %90 : vector<16x1xf32>
    %cst_41 = arith.constant 9.99999974E-6 : f32
    %92 = vector.broadcast %cst_41 : f32 to vector<16x1xf32>
    %93 = arith.addf %91, %92 : vector<16x1xf32>
    %94 = math.rsqrt %93 : vector<16x1xf32>
    %95 = vector.broadcast %94 : vector<16x1xf32> to vector<16x128xf32>
    %96 = arith.mulf %86, %95 : vector<16x128xf32>
    %97 = vector.broadcast %0 : vector<1x128xf32> to vector<16x128xf32>
    %98 = arith.mulf %96, %97 : vector<16x128xf32>
    %99 = vector.broadcast %1 : vector<1x128xf32> to vector<16x128xf32>
    %100 = arith.addf %98, %99 : vector<16x128xf32>
    %cst_42 = arith.constant dense<0.000000e+00> : vector<16x64xf32>
    %101 = tpu.matmul %100, %2, %cst_42 {dimension_numbers = #tpu.dot_dimension_numbers<[1], [0], [0], [1], [0, 0, 1, 1], [], []>} : vector<16x128xf32>, vector<128x64xf32>, vector<16x64xf32> -> vector<16x64xf32>
    %c0_43 = arith.constant 0 : index
    %c192_44 = arith.constant 192 : index
    %102 = vector.load %arg5[%c0_43, %c192_44] : memref<16x512xf32, #tpu.memory_space<vmem>>, vector<16x64xf32>
    tpu.vector_store %arg5[%c0_43, %c192_44], %101 {strides = array<i32>} : memref<16x512xf32, #tpu.memory_space<vmem>>, vector<16x64xf32>,
    %c0_45 = arith.constant 0 : index
    %c256 = arith.constant 256 : index
    %103 = vector.load %arg1[%c0_45, %c256] : memref<16x1024xf32, #tpu.memory_space<vmem>>, vector<16x64xf32>
    %c0_46 = arith.constant 0 : index
    %c768 = arith.constant 768 : index
    %104 = vector.load %arg1[%c0_46, %c768] : memref<16x1024xf32, #tpu.memory_space<vmem>>, vector<16x64xf32>
    %105 = tpu.concatenate %103, %104 in 1 : vector<16x64xf32>, vector<16x64xf32> -> vector<16x128xf32>
    %cst_47 = arith.constant dense<0.000000e+00> : vector<16xf32>
    %106 = vector.multi_reduction <add>, %105, %cst_47 [1] : vector<16x128xf32> to vector<16xf32>
    %107 = vector.shape_cast %106 : vector<16xf32> to vector<16x1xf32>
    %cst_48 = arith.constant 1.280000e+02 : f32
    %108 = vector.broadcast %cst_48 : f32 to vector<16x1xf32>
    %109 = arith.divf %107, %108 : vector<16x1xf32>
    %110 = vector.broadcast %109 : vector<16x1xf32> to vector<16x128xf32>
    %111 = arith.subf %105, %110 : vector<16x128xf32>
    %112 = arith.mulf %111, %111 : vector<16x128xf32>
    %cst_49 = arith.constant dense<0.000000e+00> : vector<16xf32>
    %113 = vector.multi_reduction <add>, %112, %cst_49 [1] : vector<16x128xf32> to vector<16xf32>
    %114 = vector.shape_cast %113 : vector<16xf32> to vector<16x1xf32>
    %cst_50 = arith.constant 1.280000e+02 : f32
    %115 = vector.broadcast %cst_50 : f32 to vector<16x1xf32>
    %116 = arith.divf %114, %115 : vector<16x1xf32>
    %cst_51 = arith.constant 9.99999974E-6 : f32
    %117 = vector.broadcast %cst_51 : f32 to vector<16x1xf32>
    %118 = arith.addf %116, %117 : vector<16x1xf32>
    %119 = math.rsqrt %118 : vector<16x1xf32>
    %120 = vector.broadcast %119 : vector<16x1xf32> to vector<16x128xf32>
    %121 = arith.mulf %111, %120 : vector<16x128xf32>
    %122 = vector.broadcast %0 : vector<1x128xf32> to vector<16x128xf32>
    %123 = arith.mulf %121, %122 : vector<16x128xf32>
    %124 = vector.broadcast %1 : vector<1x128xf32> to vector<16x128xf32>
    %125 = arith.addf %123, %124 : vector<16x128xf32>
    %cst_52 = arith.constant dense<0.000000e+00> : vector<16x64xf32>
    %126 = tpu.matmul %125, %2, %cst_52 {dimension_numbers = #tpu.dot_dimension_numbers<[1], [0], [0], [1], [0, 0, 1, 1], [], []>} : vector<16x128xf32>, vector<128x64xf32>, vector<16x64xf32> -> vector<16x64xf32>
    %c0_53 = arith.constant 0 : index
    %c256_54 = arith.constant 256 : index
    %127 = vector.load %arg5[%c0_53, %c256_54] : memref<16x512xf32, #tpu.memory_space<vmem>>, vector<16x64xf32>
    tpu.vector_store %arg5[%c0_53, %c256_54], %126 {strides = array<i32>} : memref<16x512xf32, #tpu.memory_space<vmem>>, vector<16x64xf32>,
    %c0_55 = arith.constant 0 : index
    %c320 = arith.constant 320 : index
    %128 = vector.load %arg1[%c0_55, %c320] : memref<16x1024xf32, #tpu.memory_space<vmem>>, vector<16x64xf32>
    %c0_56 = arith.constant 0 : index
    %c832 = arith.constant 832 : index
    %129 = vector.load %arg1[%c0_56, %c832] : memref<16x1024xf32, #tpu.memory_space<vmem>>, vector<16x64xf32>
    %130 = tpu.concatenate %128, %129 in 1 : vector<16x64xf32>, vector<16x64xf32> -> vector<16x128xf32>
    %cst_57 = arith.constant dense<0.000000e+00> : vector<16xf32>
    %131 = vector.multi_reduction <add>, %130, %cst_57 [1] : vector<16x128xf32> to vector<16xf32>
    %132 = vector.shape_cast %131 : vector<16xf32> to vector<16x1xf32>
    %cst_58 = arith.constant 1.280000e+02 : f32
    %133 = vector.broadcast %cst_58 : f32 to vector<16x1xf32>
    %134 = arith.divf %132, %133 : vector<16x1xf32>
    %135 = vector.broadcast %134 : vector<16x1xf32> to vector<16x128xf32>
    %136 = arith.subf %130, %135 : vector<16x128xf32>
    %137 = arith.mulf %136, %136 : vector<16x128xf32>
    %cst_59 = arith.constant dense<0.000000e+00> : vector<16xf32>
    %138 = vector.multi_reduction <add>, %137, %cst_59 [1] : vector<16x128xf32> to vector<16xf32>
    %139 = vector.shape_cast %138 : vector<16xf32> to vector<16x1xf32>
    %cst_60 = arith.constant 1.280000e+02 : f32
    %140 = vector.broadcast %cst_60 : f32 to vector<16x1xf32>
    %141 = arith.divf %139, %140 : vector<16x1xf32>
    %cst_61 = arith.constant 9.99999974E-6 : f32
    %142 = vector.broadcast %cst_61 : f32 to vector<16x1xf32>
    %143 = arith.addf %141, %142 : vector<16x1xf32>
    %144 = math.rsqrt %143 : vector<16x1xf32>
    %145 = vector.broadcast %144 : vector<16x1xf32> to vector<16x128xf32>
    %146 = arith.mulf %136, %145 : vector<16x128xf32>
    %147 = vector.broadcast %0 : vector<1x128xf32> to vector<16x128xf32>
    %148 = arith.mulf %146, %147 : vector<16x128xf32>
    %149 = vector.broadcast %1 : vector<1x128xf32> to vector<16x128xf32>
    %150 = arith.addf %148, %149 : vector<16x128xf32>
    %cst_62 = arith.constant dense<0.000000e+00> : vector<16x64xf32>
    %151 = tpu.matmul %150, %2, %cst_62 {dimension_numbers = #tpu.dot_dimension_numbers<[1], [0], [0], [1], [0, 0, 1, 1], [], []>} : vector<16x128xf32>, vector<128x64xf32>, vector<16x64xf32> -> vector<16x64xf32>
    %c0_63 = arith.constant 0 : index
    %c320_64 = arith.constant 320 : index
    %152 = vector.load %arg5[%c0_63, %c320_64] : memref<16x512xf32, #tpu.memory_space<vmem>>, vector<16x64xf32>
    tpu.vector_store %arg5[%c0_63, %c320_64], %151 {strides = array<i32>} : memref<16x512xf32, #tpu.memory_space<vmem>>, vector<16x64xf32>,
    %c0_65 = arith.constant 0 : index
    %c384 = arith.constant 384 : index
    %153 = vector.load %arg1[%c0_65, %c384] : memref<16x1024xf32, #tpu.memory_space<vmem>>, vector<16x64xf32>
    %c0_66 = arith.constant 0 : index
    %c896 = arith.constant 896 : index
    %154 = vector.load %arg1[%c0_66, %c896] : memref<16x1024xf32, #tpu.memory_space<vmem>>, vector<16x64xf32>
    %155 = tpu.concatenate %153, %154 in 1 : vector<16x64xf32>, vector<16x64xf32> -> vector<16x128xf32>
    %cst_67 = arith.constant dense<0.000000e+00> : vector<16xf32>
    %156 = vector.multi_reduction <add>, %155, %cst_67 [1] : vector<16x128xf32> to vector<16xf32>
    %157 = vector.shape_cast %156 : vector<16xf32> to vector<16x1xf32>
    %cst_68 = arith.constant 1.280000e+02 : f32
    %158 = vector.broadcast %cst_68 : f32 to vector<16x1xf32>
    %159 = arith.divf %157, %158 : vector<16x1xf32>
    %160 = vector.broadcast %159 : vector<16x1xf32> to vector<16x128xf32>
    %161 = arith.subf %155, %160 : vector<16x128xf32>
    %162 = arith.mulf %161, %161 : vector<16x128xf32>
    %cst_69 = arith.constant dense<0.000000e+00> : vector<16xf32>
    %163 = vector.multi_reduction <add>, %162, %cst_69 [1] : vector<16x128xf32> to vector<16xf32>
    %164 = vector.shape_cast %163 : vector<16xf32> to vector<16x1xf32>
    %cst_70 = arith.constant 1.280000e+02 : f32
    %165 = vector.broadcast %cst_70 : f32 to vector<16x1xf32>
    %166 = arith.divf %164, %165 : vector<16x1xf32>
    %cst_71 = arith.constant 9.99999974E-6 : f32
    %167 = vector.broadcast %cst_71 : f32 to vector<16x1xf32>
    %168 = arith.addf %166, %167 : vector<16x1xf32>
    %169 = math.rsqrt %168 : vector<16x1xf32>
    %170 = vector.broadcast %169 : vector<16x1xf32> to vector<16x128xf32>
    %171 = arith.mulf %161, %170 : vector<16x128xf32>
    %172 = vector.broadcast %0 : vector<1x128xf32> to vector<16x128xf32>
    %173 = arith.mulf %171, %172 : vector<16x128xf32>
    %174 = vector.broadcast %1 : vector<1x128xf32> to vector<16x128xf32>
    %175 = arith.addf %173, %174 : vector<16x128xf32>
    %cst_72 = arith.constant dense<0.000000e+00> : vector<16x64xf32>
    %176 = tpu.matmul %175, %2, %cst_72 {dimension_numbers = #tpu.dot_dimension_numbers<[1], [0], [0], [1], [0, 0, 1, 1], [], []>} : vector<16x128xf32>, vector<128x64xf32>, vector<16x64xf32> -> vector<16x64xf32>
    %c0_73 = arith.constant 0 : index
    %c384_74 = arith.constant 384 : index
    %177 = vector.load %arg5[%c0_73, %c384_74] : memref<16x512xf32, #tpu.memory_space<vmem>>, vector<16x64xf32>
    tpu.vector_store %arg5[%c0_73, %c384_74], %176 {strides = array<i32>} : memref<16x512xf32, #tpu.memory_space<vmem>>, vector<16x64xf32>,
    %c0_75 = arith.constant 0 : index
    %c448 = arith.constant 448 : index
    %178 = vector.load %arg1[%c0_75, %c448] : memref<16x1024xf32, #tpu.memory_space<vmem>>, vector<16x64xf32>
    %c0_76 = arith.constant 0 : index
    %c960 = arith.constant 960 : index
    %179 = vector.load %arg1[%c0_76, %c960] : memref<16x1024xf32, #tpu.memory_space<vmem>>, vector<16x64xf32>
    %180 = tpu.concatenate %178, %179 in 1 : vector<16x64xf32>, vector<16x64xf32> -> vector<16x128xf32>
    %cst_77 = arith.constant dense<0.000000e+00> : vector<16xf32>
    %181 = vector.multi_reduction <add>, %180, %cst_77 [1] : vector<16x128xf32> to vector<16xf32>
    %182 = vector.shape_cast %181 : vector<16xf32> to vector<16x1xf32>
    %cst_78 = arith.constant 1.280000e+02 : f32
    %183 = vector.broadcast %cst_78 : f32 to vector<16x1xf32>
    %184 = arith.divf %182, %183 : vector<16x1xf32>
    %185 = vector.broadcast %184 : vector<16x1xf32> to vector<16x128xf32>
    %186 = arith.subf %180, %185 : vector<16x128xf32>
    %187 = arith.mulf %186, %186 : vector<16x128xf32>
    %cst_79 = arith.constant dense<0.000000e+00> : vector<16xf32>
    %188 = vector.multi_reduction <add>, %187, %cst_79 [1] : vector<16x128xf32> to vector<16xf32>
    %189 = vector.shape_cast %188 : vector<16xf32> to vector<16x1xf32>
    %cst_80 = arith.constant 1.280000e+02 : f32
    %190 = vector.broadcast %cst_80 : f32 to vector<16x1xf32>
    %191 = arith.divf %189, %190 : vector<16x1xf32>
    %cst_81 = arith.constant 9.99999974E-6 : f32
    %192 = vector.broadcast %cst_81 : f32 to vector<16x1xf32>
    %193 = arith.addf %191, %192 : vector<16x1xf32>
    %194 = math.rsqrt %193 : vector<16x1xf32>
    %195 = vector.broadcast %194 : vector<16x1xf32> to vector<16x128xf32>
    %196 = arith.mulf %186, %195 : vector<16x128xf32>
    %197 = vector.broadcast %0 : vector<1x128xf32> to vector<16x128xf32>
    %198 = arith.mulf %196, %197 : vector<16x128xf32>
    %199 = vector.broadcast %1 : vector<1x128xf32> to vector<16x128xf32>
    %200 = arith.addf %198, %199 : vector<16x128xf32>
    %cst_82 = arith.constant dense<0.000000e+00> : vector<16x64xf32>
    %201 = tpu.matmul %200, %2, %cst_82 {dimension_numbers = #tpu.dot_dimension_numbers<[1], [0], [0], [1], [0, 0, 1, 1], [], []>} : vector<16x128xf32>, vector<128x64xf32>, vector<16x64xf32> -> vector<16x64xf32>
    %c0_83 = arith.constant 0 : index
    %c448_84 = arith.constant 448 : index
    %202 = vector.load %arg5[%c0_83, %c448_84] : memref<16x512xf32, #tpu.memory_space<vmem>>, vector<16x64xf32>
    tpu.vector_store %arg5[%c0_83, %c448_84], %201 {strides = array<i32>} : memref<16x512xf32, #tpu.memory_space<vmem>>, vector<16x64xf32>,
    return
  }
  func.func @transform_0(%arg0: i32) -> (i32, i32) {
    %c0_i32 = arith.constant 0 : i32
    %c0_i32_0 = arith.constant 0 : i32
    return %arg0, %c0_i32 : i32, i32
  }
  func.func @transform_1(%arg0: i32) -> (i32, i32) {
    %c0_i32 = arith.constant 0 : i32
    %c0_i32_0 = arith.constant 0 : i32
    %c0_i32_1 = arith.constant 0 : i32
    return %c0_i32, %c0_i32_0 : i32, i32
  }
  func.func @transform_2(%arg0: i32) -> (i32, i32) {
    %c0_i32 = arith.constant 0 : i32
    %c0_i32_0 = arith.constant 0 : i32
    %c0_i32_1 = arith.constant 0 : i32
    return %c0_i32, %c0_i32_0 : i32, i32
  }
  func.func @transform_3(%arg0: i32) -> (i32, i32) {
    %c0_i32 = arith.constant 0 : i32
    %c0_i32_0 = arith.constant 0 : i32
    %c0_i32_1 = arith.constant 0 : i32
    return %c0_i32, %c0_i32_0 : i32, i32
  }
  func.func @transform_4(%arg0: i32) -> (i32, i32) {
    %c0_i32 = arith.constant 0 : i32
    %c0_i32_0 = arith.constant 0 : i32
    return %arg0, %c0_i32 : i32, i32
  }
}

</mosaic_0001>

<bundles_post_ra>
// kernel: tpu_custom_call.1
= control target key start
LH: loop header
LB: loop body
LE: loop exit
PB: predicated region body
PF: predicated region fallthrough
CT: control target
= control target key end

     0   :  { %s1777_s19 = smov 64   ;;  %s2308_s0 = inlined_call_operand.vmem [shape: f32[16,1024], index: 0, kind: input, shape index: {}]   ;;  %s2309_s1 = inlined_call_operand.vmem [shape: f32[1,128], index: 1, kind: input, shape index: {}]   ;;  %s2310_s2 = inlined_call_operand.vmem [shape: f32[1,128], index: 2, kind: input, shape index: {}]   ;;  %s2311_s3 = inlined_call_operand.vmem [shape: f32[128,64], index: 3, kind: input, shape index: {}]   ;;  %s2312_s4 = inlined_call_operand.hbm [shape: f32[16,512], index: 4, kind: output, shape index: {}]  }
   0x1   :  { %v167_v0 = vld [vmem:[%s2308_s0] sm:$0xff]  ;;  %v410_v1 = vld [vmem:[%s2308_s0 + $0x8] sm:$0xff] }
   0x2   :  { %173 = vrot.lane.b32.xlu0 %v167_v0, %s1777_s19  ;;  %416 = vrot.lane.b32.xlu1 %v410_v1, %s1777_s19  ;;  %v168_v2 = vld [vmem:[%s2308_s0 + $0x40] sm:$0xff]  ;;  %v411_v3 = vld [vmem:[%s2308_s0 + $0x48] sm:$0xff] }
   0x3   :  { %9 = vsyncpa [#allocation3], 0  ;;  %v38_v4 = vld [vmem:[%s2308_s0 + $0x20] sm:$0xff]  ;;  %v1833_v6 = vld [vmem:[%s2308_s0 + $0x50] sm:$0xff]  ;;  %vm48_vm0 = vcmask 523264   ;;  %vm290_vm1 = vcmask 1048064  }
   0x4   :  { %v39_v5 = vld [vmem:[%s2308_s0 + $0x60] sm:$0xff]  ;;  %v1838_v7 = vld [vmem:[%s2308_s0 + $0x10] sm:$0xff]  ;;  %v296_v8 = vld [vmem:[%s2308_s0 + $0x68] sm:$0xff] }
   0x5   :  { %v295_v9 = vld [vmem:[%s2308_s0 + $0x28] sm:$0xff]  ;;  %v1865_v18 = vld [vmem:[%s2308_s0 + $0x58] sm:$0xff]  ;;  %v538_v24 = vld [vmem:[%s2308_s0 + $0x70] sm:$0xff] }
   0x6   :  { %175 = vrot.lane.b32.xlu0 %v168_v2, %s1777_s19  ;;  %418 = vrot.lane.b32.xlu1 %v411_v3, %s1777_s19  ;;  %v1870_v19 = vld [vmem:[%s2308_s0 + $0x18] sm:$0xff]  ;;  %v537_v25 = vld [vmem:[%s2308_s0 + $0x30] sm:$0xff] }
   0x7   :  { %v779_v34 = vld [vmem:[%s2308_s0 + $0x38] sm:$0xff]  ;;  %v20_v36 = vld [vmem:[%s2311_s3] sm:$0xff]  ;;  %v21_v37 = vld [vmem:[%s2311_s3 + $0x8] sm:$0xff] }
   0x8   :  { %v22_v38 = vld [vmem:[%s2311_s3 + $0x10] sm:$0xff]  ;;  %v1921_v40 = vpack.c.bf16 %v21_v37, %v20_v36  ;;  %v23_v41 = vld [vmem:[%s2311_s3 + $0x18] sm:$0xff]  ;;  %v24_v49 = vld [vmem:[%s2311_s3 + $0x20] sm:$0xff] }
   0x9   :  { %v1926_v42 = vpack.c.bf16 %v23_v41, %v22_v38  ;;  %v25_v50 = vld [vmem:[%s2311_s3 + $0x28] sm:$0xff]  ;;  %v26_v53 = vld [vmem:[%s2311_s3 + $0x30] sm:$0xff]  ;;  %v27_v54 = vld [vmem:[%s2311_s3 + $0x38] sm:$0xff] }
   0xa   :  { %42 = vrot.lane.b32.xlu0 %v38_v4, %s1777_s19  ;;  %44 = vrot.lane.b32.xlu1 %v39_v5, %s1777_s19  ;;  %v1950_v52 = vpack.c.bf16 %v25_v50, %v24_v49  ;;  %v1962_v57 = vpack.c.bf16 %v27_v54, %v26_v53  ;;  %v28_v59 = vld [vmem:[%s2311_s3 + $0x40] sm:$0xff]  ;;  %v29_v60 = vld [vmem:[%s2311_s3 + $0x48] sm:$0xff] }
   0xb   :  { %1494 = vmatprep.subr.bf16.mxu1 %v1921_v40  ;;  %1462 = vmatprep.subr.bf16.mxu0 %v1921_v40  ;;  %v1980_v62 = vpack.c.bf16 %v29_v60, %v28_v59  ;;  %v780_v63 = vld [vmem:[%s2308_s0 + $0x78] sm:$0xff] }
   0xc   :  { %1496 = vmatpush3.bf16.msra.mxu1 %v1921_v40  ;;  %1464 = vmatpush3.bf16.msra.mxu0 %v1921_v40 }
   0xd   :  { %1498 = vmatprep.subr.bf16.mxu1 %v1926_v42  ;;  %1466 = vmatprep.subr.bf16.mxu0 %v1926_v42 }
   0xe   :  { %660 = vrot.lane.b32.xlu1 %v1833_v6, %s1777_s19  ;;  %658 = vrot.lane.b32.xlu0 %v1838_v7, %s1777_s19 }
  0x10   :  { %1500 = vmatpush3.bf16.msra.mxu1 %v1926_v42  ;;  %1468 = vmatpush3.bf16.msra.mxu0 %v1926_v42 }
  0x11   :  { %1502 = vmatprep.subr.bf16.mxu1 %v1950_v52  ;;  %1470 = vmatprep.subr.bf16.mxu0 %v1950_v52 }
  0x12   :  { %301 = vrot.lane.b32.xlu1 %v296_v8, %s1777_s19  ;;  %299 = vrot.lane.b32.xlu0 %v295_v9, %s1777_s19 }
  0x14   :  { %1504 = vmatpush3.bf16.msra.mxu1 %v1950_v52  ;;  %1472 = vmatpush3.bf16.msra.mxu0 %v1950_v52 }
  0x15   :  { %1506 = vmatprep.subr.bf16.mxu1 %v1962_v57  ;;  %1474 = vmatprep.subr.bf16.mxu0 %v1962_v57 }
  0x18   :  { %1508 = vmatpush3.bf16.msra.mxu1 %v1962_v57  ;;  %1476 = vmatpush3.bf16.msra.mxu0 %v1962_v57 }
  0x19   :  { %1510 = vmatprep.subr.bf16.mxu1 %v1980_v62  ;;  %1478 = vmatprep.subr.bf16.mxu0 %v1980_v62 }
  0x1c   :  { %1512 = vmatpush3.bf16.msra.mxu1 %v1980_v62  ;;  %1480 = vmatpush3.bf16.msra.mxu0 %v1980_v62 }
  0x74   :  { %v174_v10 = vpop.permute.xlu0 %173  ;;  %v417_v11 = vpop.permute.xlu1 %416 }
  0x75   :  { %v179_v12 = vsel %vm48_vm0, %v174_v10, %v38_v4  ;;  %v1854_v13 = vsel %vm48_vm0, %v417_v11, %v295_v9  ;;  %v32_v4 = vld [vmem:[%s2311_s3 + $0x60] sm:$0xff]  ;;  %v35_v10 = vld [vmem:[%s2311_s3 + $0x78] sm:$0xff] }
  0x76   :  { %181 = vadd.xlane.f32.xlu0 %v179_v12 }
  0x78   :  { %v176_v14 = vpop.permute.xlu0 %175  ;;  %v419_v15 = vpop.permute.xlu1 %418 }
  0x79   :  { %v180_v16 = vsel %vm48_vm0, %v176_v14, %v39_v5  ;;  %v1859_v17 = vsel %vm48_vm0, %v419_v15, %v296_v8  ;;  %v33_v5 = vld [vmem:[%s2311_s3 + $0x68] sm:$0xff]  ;;  %v34_v8 = vld [vmem:[%s2311_s3 + $0x70] sm:$0xff] }
  0x7a   :  { %183 = vadd.xlane.f32.xlu1 %v180_v16  ;;  %424 = vadd.xlane.f32.xlu0 %v1854_v13  ;;  %v2012_v9 = vpack.c.bf16 %v33_v5, %v32_v4  ;;  %v2018_v11 = vpack.c.bf16 %v35_v10, %v34_v8  ;;  %v2099_v4 = vld [vmem:[%s2310_s2] ss:$0 sm:$0xff] }
  0x7c   :  { %v43_v20 = vpop.permute.xlu0 %42  ;;  %v45_v22 = vpop.permute.xlu1 %44 }
  0x7d   :  { %v1877_v21 = vsel %vm48_vm0, %v167_v0, %v43_v20  ;;  %v1881_v23 = vsel %vm48_vm0, %v168_v2, %v45_v22  ;;  %v30_v0 = vld [vmem:[%s2311_s3 + $0x50] sm:$0xff] }
  0x7e   :  { %426 = vadd.xlane.f32.xlu1 %v1859_v17 }
  0x80   :  { %v661_v26 = vpop.permute.xlu1 %660  ;;  %v659_v27 = vpop.permute.xlu0 %658 }
  0x81   :  { %v1893_v28 = vsel %vm48_vm0, %v659_v27, %v537_v25  ;;  %v1897_v30 = vsel %vm48_vm0, %v661_v26, %v538_v24 }
  0x84   :  { %v302_v29 = vpop.permute.xlu1 %301  ;;  %v300_v32 = vpop.permute.xlu0 %299 }
  0x85   :  { %v1900_v31 = vsel %vm48_vm0, %v411_v3, %v302_v29  ;;  %v1905_v33 = vsel %vm48_vm0, %v410_v1, %v300_v32  ;;  %v31_v1 = vld [vmem:[%s2311_s3 + $0x58] sm:$0xff] }
  0x86   :  { %v1997_v3 = vpack.c.bf16 %v31_v1, %v30_v0 }
  0x88   :  { %1514 = vmatprep.subr.bf16.mxu1 %v1997_v3  ;;  %1482 = vmatprep.subr.bf16.mxu0 %v1997_v3 }
  0x89   :  { %1516 = vmatpush3.bf16.msra.mxu1 %v1997_v3  ;;  %1484 = vmatpush3.bf16.msra.mxu0 %v1997_v3 }
  0x8a   :  { %1518 = vmatprep.subr.bf16.mxu1 %v2012_v9  ;;  %1486 = vmatprep.subr.bf16.mxu0 %v2012_v9 }
  0x8d   :  { %1520 = vmatpush3.bf16.msra.mxu1 %v2012_v9  ;;  %1488 = vmatpush3.bf16.msra.mxu0 %v2012_v9 }
  0x8e   :  { %1522 = vmatprep.subr.bf16.mxu1 %v2018_v11  ;;  %1490 = vmatprep.subr.bf16.mxu0 %v2018_v11 }
  0x8f   :  { %902 = vrot.lane.b32.xlu1 %v1865_v18, %s1777_s19 }
  0x90   :  { %900 = vrot.lane.b32.xlu0 %v1870_v19, %s1777_s19 }
  0x91   :  { %1524 = vmatpush3.bf16.msra.mxu1 %v2018_v11  ;;  %1492 = vmatpush3.bf16.msra.mxu0 %v2018_v11 }
  0x92   :  { %1558 = vmatprep.subr.bf16.mxu1 %v1921_v40  ;;  %1526 = vmatprep.subr.bf16.mxu0 %v1921_v40 }
  0xaf   :  { %51 = vadd.xlane.f32.xlu0 %v1877_v21 }
  0xb3   :  { %53 = vadd.xlane.f32.xlu1 %v1881_v23 }
  0xc4   :  { %543 = vrot.lane.b32.xlu1 %v538_v24, %s1777_s19 }
  0xc5   :  { %541 = vrot.lane.b32.xlu0 %v537_v25, %s1777_s19 }
  0xe4   :  { %666 = vadd.xlane.f32.xlu0 %v1893_v28 }
  0xe8   :  { %668 = vadd.xlane.f32.xlu1 %v1897_v30  ;;  %309 = vadd.xlane.f32.xlu0 %v1900_v31 }
  0xec   :  { %307 = vadd.xlane.f32.xlu1 %v1905_v33 }
  0xfd   :  { %783 = vrot.lane.b32.xlu1 %v779_v34, %s1777_s19 }
 0x103   :  { %v182_v35 = vpop.xlane.xlu0 %181 }
 0x104   :  { %v185_v39 = vmul.f32 0.0078125, %v182_v35 }
 0x106   :  { %v1928_v43 = vsub.f32 %v179_v12, %v185_v39 }
 0x107   :  { %v184_v44 = vpop.xlane.xlu1 %183  ;;  %v425_v51 = vpop.xlane.xlu0 %424 }
 0x108   :  { %v186_v45 = vmul.f32 0.0078125, %v184_v44  ;;  %v189_v46 = vmul.f32 %v1928_v43, %v1928_v43  ;;  %v428_v55 = vmul.f32 0.0078125, %v425_v51 }
 0x10a   :  { %v1938_v47 = vsub.f32 %v180_v16, %v186_v45  ;;  %191 = vadd.xlane.f32.xlu0 %v189_v46  ;;  %v1978_v61 = vsub.f32 %v1854_v13, %v428_v55 }
 0x10b   :  { %v901_v56 = vpop.permute.xlu0 %900  ;;  %v427_v12 = vpop.xlane.xlu1 %426 }
 0x10c   :  { %v190_v48 = vmul.f32 %v1938_v47, %v1938_v47  ;;  %v1967_v58 = vsel %vm48_vm0, %v901_v56, %v779_v34  ;;  %v432_v2 = vmul.f32 %v1978_v61, %v1978_v61  ;;  %v429_v14 = vmul.f32 0.0078125, %v427_v12 }
 0x10e   :  { %193 = vadd.xlane.f32.xlu0 %v190_v48  ;;  %v2035_v24 = vsub.f32 %v1859_v17, %v429_v14 }
 0x10f   :  { %v903_v15 = vpop.permute.xlu1 %902 }
 0x110   :  { %v2043_v27 = vsel %vm48_vm0, %v903_v15, %v780_v63  ;;  %v433_v17 = vmul.f32 %v2035_v24, %v2035_v24 }
 0x121   :  { %908 = vadd.xlane.f32.xlu1 %v1967_v58 }
 0x124   :  { %785 = vrot.lane.b32.xlu0 %v780_v63, %s1777_s19 }
 0x125   :  { %434 = vadd.xlane.f32.xlu1 %v432_v2  ;;  %v2093_v2 = vld [vmem:[%s2309_s1] ss:$0 sm:$0xff]  ;;  %s1778_s1 = smov [#allocation2]  }
 0x126   :  { %s1024_s2 = sshll.u32 %s1778_s1, 4  ;;  %s1025_s2 = int_to_ptr.vmem [resolvable:$true] %s1024_s2 }
 0x127   :  { %p1758_p1 = scmp.lt.s32.totalorder %s1025_s2, %s1025_s2 }
 0x13c   :  { %v52_v13 = vpop.xlane.xlu0 %51 }
 0x13d   :  { %v56_v16 = vmul.f32 0.0078125, %v52_v13 }
 0x13f   :  { %v2032_v20 = vsub.f32 %v1877_v21, %v56_v16 }
 0x140   :  { %v542_v22 = vpop.permute.xlu0 %541  ;;  %v54_v25 = vpop.xlane.xlu1 %53 }
 0x141   :  { %v2039_v26 = vsel %vm48_vm0, %v1838_v7, %v542_v22  ;;  %v60_v21 = vmul.f32 %v2032_v20, %v2032_v20  ;;  %v57_v29 = vmul.f32 0.0078125, %v54_v25 }
 0x142   :  { %549 = vadd.xlane.f32.xlu1 %v2039_v26 }
 0x143   :  { %910 = vadd.xlane.f32.xlu0 %v2043_v27  ;;  %v2055_v34 = vsub.f32 %v1881_v23, %v57_v29 }
 0x144   :  { %v544_v32 = vpop.permute.xlu1 %543 }
 0x145   :  { %v2052_v7 = vsel %vm48_vm0, %v1833_v6, %v544_v32  ;;  %v61_v35 = vmul.f32 %v2055_v34, %v2055_v34 }
 0x146   :  { %62 = vadd.xlane.f32.xlu1 %v60_v21 }
 0x147   :  { %436 = vadd.xlane.f32.xlu0 %v433_v17 }
 0x14b   :  { %551 = vadd.xlane.f32.xlu0 %v2052_v7 }
 0x14f   :  { %64 = vadd.xlane.f32.xlu0 %v61_v35 }
 0x171   :  { %v667_v36 = vpop.xlane.xlu0 %666 }
 0x172   :  { %v670_v37 = vmul.f32 0.0078125, %v667_v36 }
 0x174   :  { %v2061_v38 = vsub.f32 %v1893_v28, %v670_v37 }
 0x175   :  { %v669_v39 = vpop.xlane.xlu1 %668  ;;  %v310_v50 = vpop.xlane.xlu0 %309 }
 0x176   :  { %v671_v41 = vmul.f32 0.0078125, %v669_v39  ;;  %v674_v6 = vmul.f32 %v2061_v38, %v2061_v38  ;;  %v312_v55 = vmul.f32 0.0078125, %v310_v50 }
 0x178   :  { %v2066_v44 = vsub.f32 %v1897_v30, %v671_v41  ;;  %676 = vadd.xlane.f32.xlu1 %v674_v6  ;;  %v2081_v60 = vsub.f32 %v1900_v31, %v312_v55 }
 0x179   :  { %v308_v23 = vpop.xlane.xlu1 %307 }
 0x17a   :  { %v311_v45 = vmul.f32 0.0078125, %v308_v23  ;;  %v675_v46 = vmul.f32 %v2066_v44, %v2066_v44  ;;  %v316_v0 = vmul.f32 %v2081_v60, %v2081_v60 }
 0x17c   :  { %678 = vadd.xlane.f32.xlu0 %v675_v46  ;;  %v2071_v48 = vsub.f32 %v1905_v33, %v311_v45 }
 0x17d   :  { %v784_v28 = vpop.permute.xlu1 %783 }
 0x17e   :  { %v2075_v49 = vsel %vm48_vm0, %v1870_v19, %v784_v28  ;;  %v315_v30 = vmul.f32 %v2071_v48, %v2071_v48 }
 0x17f   :  { %791 = vadd.xlane.f32.xlu1 %v2075_v49 }
 0x183   :  { %317 = vadd.xlane.f32.xlu1 %v315_v30 }
 0x197   :  { %v192_v51 = vpop.xlane.xlu0 %191 }
 0x198   :  { %v195_v53 = vmul.f32 0.0078125, %v192_v51 }
 0x19a   :  { %v197_v54 = vadd.f32 1e-05, %v195_v53 }
 0x19b   :  { %v194_v56 = vpop.xlane.xlu0 %193 }
 0x19c   :  { %1721 = vrsqrt.f32 %v197_v54  ;;  %v196_v33 = vmul.f32 0.0078125, %v194_v56 }
 0x19e   :  { %v198_v59 = vadd.f32 1e-05, %v196_v33 }
 0x19f   :  { %v786_v19 = vpop.permute.xlu0 %785 }
 0x1a0   :  { %1723 = vrsqrt.f32 %v198_v59  ;;  %v2085_v63 = vsel %vm48_vm0, %v1865_v18, %v786_v19 }
 0x1a1   :  { %793 = vadd.xlane.f32.xlu0 %v2085_v63 }
 0x1a5   :  { %319 = vadd.xlane.f32.xlu0 %v316_v0 }
 0x1a6   :  { %v1722_v1 = vpop.eup %1721 }
 0x1a7   :  { %v201_v31 = vmul.f32 %v1722_v1, %v1928_v43 }
 0x1a9   :  { %v203_v18 = vmul.f32 %v2093_v2, %v201_v31 }
 0x1aa   :  { %v1724_v5 = vpop.eup %1723 }
 0x1ab   :  { %v205_v8 = vadd.f32 %v2099_v4, %v203_v18  ;;  %v202_v10 = vmul.f32 %v1724_v5, %v1938_v47 }
 0x1ad   :  { %1248 = vmatprep.mubr.f32.mxu1 %v205_v8  ;;  %v204_v12 = vmul.f32 %v2093_v2, %v202_v10 }
 0x1ae   :  { %v909_v13 = vpop.xlane.xlu1 %908 }
 0x1af   :  { %v912_v14 = vmul.f32 0.0078125, %v909_v13  ;;  %v206_v15 = vadd.f32 %v2099_v4, %v204_v12 }
 0x1b1   :  { %v2107_v43 = vsub.f32 %v1967_v58, %v912_v14  ;;  %1249 = vmatmul.mubr.f32.vlgmr.msra.gmra.mrb[0].mxu1 %v206_v15 }
 0x1b2   :  { %v435_v16 = vpop.xlane.xlu1 %434  ;;  %1560 = vmatpush3.bf16.msra.mxu1 %v1921_v40 }
 0x1b3   :  { %v438_v22 = vmul.f32 0.0078125, %v435_v16  ;;  %v916_v25 = vmul.f32 %v2107_v43, %v2107_v43  ;;  %1562 = vmatprep.subr.bf16.mxu1 %v1926_v42 }
 0x1b5   :  { %v440_v47 = vadd.f32 1e-05, %v438_v22  ;;  %918 = vadd.xlane.f32.xlu1 %v916_v25 }
 0x1b6   :  { %1564 = vmatpush3.bf16.msra.mxu1 %v1926_v42 }
 0x1b7   :  { %1725 = vrsqrt.f32 %v440_v47  ;;  %1566 = vmatprep.subr.bf16.mxu1 %v1950_v52 }
 0x1ba   :  { %1568 = vmatpush3.bf16.msra.mxu1 %v1950_v52 }
 0x1bb   :  { %1570 = vmatprep.subr.bf16.mxu1 %v1962_v57 }
 0x1be   :  { %1572 = vmatpush3.bf16.msra.mxu1 %v1962_v57 }
 0x1bf   :  { %1574 = vmatprep.subr.bf16.mxu1 %v1980_v62 }
 0x1c1   :  { %v1726_v58 = vpop.eup %1725 }
 0x1c2   :  { %v444_v21 = vmul.f32 %v1726_v58, %v1978_v61  ;;  %1576 = vmatpush3.bf16.msra.mxu1 %v1980_v62 }
 0x1c3   :  { %1578 = vmatprep.subr.bf16.mxu1 %v1997_v3 }
 0x1c4   :  { %v446_v29 = vmul.f32 %v2093_v2, %v444_v21 }
 0x1c6   :  { %v448_v17 = vadd.f32 %v2099_v4, %v446_v29  ;;  %1580 = vmatpush3.bf16.msra.mxu1 %v1997_v3 }
 0x1c7   :  { %1582 = vmatprep.subr.bf16.mxu1 %v2012_v9 }
 0x1c8   :  { %1318 = vmatprep.mubr.f32.mxu1 %v448_v17 }
 0x1ca   :  { %1584 = vmatpush3.bf16.msra.mxu1 %v2012_v9 }
 0x1cb   :  { %1586 = vmatprep.subr.bf16.mxu1 %v2018_v11 }
 0x1ce   :  { %1588 = vmatpush3.bf16.msra.mxu1 %v2018_v11 }
 0x1cf   :  { %v550_v61 = vpop.xlane.xlu1 %549  ;;  %1622 = vmatprep.subr.bf16.mxu1 %v1921_v40 }
 0x1d0   :  { %v553_v32 = vmul.f32 0.0078125, %v550_v61  ;;  %v911_v35 = vpop.xlane.xlu0 %910 }
 0x1d1   :  { %v913_v36 = vmul.f32 0.0078125, %v911_v35 }
 0x1d2   :  { %v2131_v37 = vsub.f32 %v2039_v26, %v553_v32 }
 0x1d3   :  { %v2134_v39 = vsub.f32 %v2043_v27, %v913_v36  ;;  %v63_v41 = vpop.xlane.xlu1 %62 }
 0x1d4   :  { %v66_v6 = vmul.f32 0.0078125, %v63_v41  ;;  %v437_v23 = vpop.xlane.xlu0 %436  ;;  %v557_v45 = vmul.f32 %v2131_v37, %v2131_v37 }
 0x1d5   :  { %v439_v46 = vmul.f32 0.0078125, %v437_v23  ;;  %v917_v28 = vmul.f32 %v2134_v39, %v2134_v39 }
 0x1d6   :  { %v68_v30 = vadd.f32 1e-05, %v66_v6  ;;  %559 = vadd.xlane.f32.xlu1 %v557_v45 }
 0x1d7   :  { %v441_v50 = vadd.f32 1e-05, %v439_v46  ;;  %920 = vadd.xlane.f32.xlu0 %v917_v28 }
 0x1d8   :  { %1727 = vrsqrt.f32 %v68_v30  ;;  %v552_v26 = vpop.xlane.xlu0 %551 }
 0x1d9   :  { %1729 = vrsqrt.f32 %v441_v50  ;;  %v554_v51 = vmul.f32 0.0078125, %v552_v26 }
 0x1db   :  { %v2141_v27 = vsub.f32 %v2052_v7, %v554_v51 }
 0x1dc   :  { %v65_v53 = vpop.xlane.xlu0 %64 }
 0x1dd   :  { %v67_v54 = vmul.f32 0.0078125, %v65_v53  ;;  %v558_v55 = vmul.f32 %v2141_v27, %v2141_v27 }
 0x1df   :  { %v69_v56 = vadd.f32 1e-05, %v67_v54  ;;  %561 = vadd.xlane.f32.xlu0 %v558_v55 }
 0x1e1   :  { %1731 = vrsqrt.f32 %v69_v56 }
 0x1e2   :  { %v1728_v33 = vpop.eup %1727 }
 0x1e3   :  { %v1730_v59 = vpop.eup %1729  ;;  %v72_v19 = vmul.f32 %v1728_v33, %v2032_v20 }
 0x1e4   :  { %v445_v0 = vmul.f32 %v1730_v59, %v2035_v24 }
 0x1e5   :  { %v80_v1 = vmul.f32 %v2093_v2, %v72_v19 }
 0x1e6   :  { %v447_v31 = vmul.f32 %v2093_v2, %v445_v0 }
 0x1e7   :  { %v88_v7 = vadd.f32 %v2099_v4, %v80_v1 }
 0x1e8   :  { %v449_v18 = vadd.f32 %v2099_v4, %v447_v31 }
 0x1e9   :  { %1213 = vmatprep.mubr.f32.mxu0 %v88_v7 }
 0x1ea   :  { %1319 = vmatmul.mubr.f32.vlgmr.msra.gmra.mrb[2].mxu1 %v449_v18 }
 0x1eb   :  { %v1732_v5 = vpop.eup %1731  ;;  %1624 = vmatpush3.bf16.msra.mxu1 %v1921_v40 }
 0x1ec   :  { %v73_v8 = vmul.f32 %v1732_v5, %v2055_v34  ;;  %1626 = vmatprep.subr.bf16.mxu1 %v1926_v42 }
 0x1ee   :  { %v81_v20 = vmul.f32 %v2093_v2, %v73_v8 }
 0x1ef   :  { %1628 = vmatpush3.bf16.msra.mxu1 %v1926_v42 }
 0x1f0   :  { %v89_v24 = vadd.f32 %v2099_v4, %v81_v20  ;;  %1630 = vmatprep.subr.bf16.mxu1 %v1950_v52 }
 0x1f2   :  { %1214 = vmatmul.mubr.f32.vlgmr.msra.gmra.mrb[0].mxu0 %v89_v24 }
 0x1f3   :  { %1632 = vmatpush3.bf16.msra.mxu1 %v1950_v52  ;;  %1528 = vmatpush3.bf16.msra.mxu0 %v1921_v40 }
 0x1f4   :  { %1634 = vmatprep.subr.bf16.mxu1 %v1962_v57  ;;  %1530 = vmatprep.subr.bf16.mxu0 %v1926_v42 }
 0x1f7   :  { %1636 = vmatpush3.bf16.msra.mxu1 %v1962_v57  ;;  %1532 = vmatpush3.bf16.msra.mxu0 %v1926_v42 }
 0x1f8   :  { %1638 = vmatprep.subr.bf16.mxu1 %v1980_v62  ;;  %1534 = vmatprep.subr.bf16.mxu0 %v1950_v52 }
 0x1fb   :  { %1640 = vmatpush3.bf16.msra.mxu1 %v1980_v62  ;;  %1536 = vmatpush3.bf16.msra.mxu0 %v1950_v52 }
 0x1fc   :  { %1642 = vmatprep.subr.bf16.mxu1 %v1997_v3  ;;  %1538 = vmatprep.subr.bf16.mxu0 %v1962_v57 }
 0x1ff   :  { %1644 = vmatpush3.bf16.msra.mxu1 %v1997_v3  ;;  %1540 = vmatpush3.bf16.msra.mxu0 %v1962_v57 }
 0x200   :  { %1646 = vmatprep.subr.bf16.mxu1 %v2012_v9  ;;  %1542 = vmatprep.subr.bf16.mxu0 %v1980_v62 }
 0x203   :  { %1648 = vmatpush3.bf16.msra.mxu1 %v2012_v9  ;;  %1544 = vmatpush3.bf16.msra.mxu0 %v1980_v62 }
 0x204   :  { %1650 = vmatprep.subr.bf16.mxu1 %v2018_v11  ;;  %1546 = vmatprep.subr.bf16.mxu0 %v1997_v3 }
 0x205   :  { %v677_v34 = vpop.xlane.xlu1 %676 }
 0x206   :  { %v680_v10 = vmul.f32 0.0078125, %v677_v34 }
 0x207   :  { %1652 = vmatpush3.bf16.msra.mxu1 %v2018_v11  ;;  %1548 = vmatpush3.bf16.msra.mxu0 %v1997_v3 }
 0x208   :  { %v682_v12 = vadd.f32 1e-05, %v680_v10  ;;  %1550 = vmatprep.subr.bf16.mxu0 %v2012_v9  ;;  %1686 = vmatprep.subr.bf16.mxu1 %v1921_v40 }
 0x209   :  { %v679_v13 = vpop.xlane.xlu0 %678 }
 0x20a   :  { %1733 = vrsqrt.f32 %v682_v12  ;;  %v681_v14 = vmul.f32 0.0078125, %v679_v13 }
 0x20b   :  { %1552 = vmatpush3.bf16.msra.mxu0 %v2012_v9 }
 0x20c   :  { %v683_v15 = vadd.f32 1e-05, %v681_v14  ;;  %v792_v16 = vpop.xlane.xlu1 %791  ;;  %1554 = vmatprep.subr.bf16.mxu0 %v2018_v11 }
 0x20d   :  { %v795_v22 = vmul.f32 0.0078125, %v792_v16 }
 0x20e   :  { %1735 = vrsqrt.f32 %v683_v15 }
 0x20f   :  { %v2185_v25 = vsub.f32 %v2075_v49, %v795_v22  ;;  %1556 = vmatpush3.bf16.msra.mxu0 %v2018_v11 }
 0x210   :  { %v318_v47 = vpop.xlane.xlu1 %317  ;;  %1590 = vmatprep.subr.bf16.mxu0 %v1921_v40 }
 0x211   :  { %v321_v58 = vmul.f32 0.0078125, %v318_v47  ;;  %v799_v21 = vmul.f32 %v2185_v25, %v2185_v25 }
 0x213   :  { %v323_v29 = vadd.f32 1e-05, %v321_v58  ;;  %801 = vadd.xlane.f32.xlu1 %v799_v21 }
 0x214   :  { %v1734_v17 = vpop.eup %1733 }
 0x215   :  { %1737 = vrsqrt.f32 %v323_v29  ;;  %v686_v61 = vmul.f32 %v1734_v17, %v2061_v38 }
 0x217   :  { %v688_v32 = vmul.f32 %v2093_v2, %v686_v61 }
 0x218   :  { %v1736_v35 = vpop.eup %1735 }
 0x219   :  { %v690_v49 = vadd.f32 %v2099_v4, %v688_v32  ;;  %v687_v36 = vmul.f32 %v1736_v35, %v2066_v44 }
 0x21b   :  { %1388 = vmatprep.mubr.f32.mxu1 %v690_v49  ;;  %v689_v41 = vmul.f32 %v2093_v2, %v687_v36 }
 0x21d   :  { %v691_v6 = vadd.f32 %v2099_v4, %v689_v41 }
 0x21f   :  { %v1738_v23 = vpop.eup %1737  ;;  %1389 = vmatmul.mubr.f32.vlgmr.msra.gmra.mrb[4].mxu1 %v691_v6 }
 0x220   :  { %v327_v45 = vmul.f32 %v1738_v23, %v2071_v48  ;;  %1688 = vmatpush3.bf16.msra.mxu1 %v1921_v40 }
 0x221   :  { %1690 = vmatprep.subr.bf16.mxu1 %v1926_v42 }
 0x222   :  { %v329_v38 = vmul.f32 %v2093_v2, %v327_v45 }
 0x224   :  { %v331_v46 = vadd.f32 %v2099_v4, %v329_v38  ;;  %1692 = vmatpush3.bf16.msra.mxu1 %v1926_v42 }
 0x225   :  { %1694 = vmatprep.subr.bf16.mxu1 %v1950_v52 }
 0x226   :  { %1283 = vmatprep.mubr.f32.mxu0 %v331_v46 }
 0x228   :  { %1696 = vmatpush3.bf16.msra.mxu1 %v1950_v52 }
 0x229   :  { %1698 = vmatprep.subr.bf16.mxu1 %v1962_v57 }
 0x22c   :  { %1700 = vmatpush3.bf16.msra.mxu1 %v1962_v57 }
 0x22d   :  { %1702 = vmatprep.subr.bf16.mxu1 %v1980_v62 }
 0x22e   :  { %v794_v44 = vpop.xlane.xlu0 %793 }
 0x22f   :  { %v796_v48 = vmul.f32 0.0078125, %v794_v44 }
 0x230   :  { %1704 = vmatpush3.bf16.msra.mxu1 %v1980_v62 }
 0x231   :  { %v2210_v28 = vsub.f32 %v2085_v63, %v796_v48  ;;  %1706 = vmatprep.subr.bf16.mxu1 %v1997_v3 }
 0x232   :  { %v320_v30 = vpop.xlane.xlu0 %319 }
 0x233   :  { %v322_v50 = vmul.f32 0.0078125, %v320_v30  ;;  %v800_v26 = vmul.f32 %v2210_v28, %v2210_v28 }
 0x234   :  { %1708 = vmatpush3.bf16.msra.mxu1 %v1997_v3 }
 0x235   :  { %v324_v51 = vadd.f32 1e-05, %v322_v50  ;;  %803 = vadd.xlane.f32.xlu0 %v800_v26  ;;  %1710 = vmatprep.subr.bf16.mxu1 %v2012_v9 }
 0x237   :  { %1739 = vrsqrt.f32 %v324_v51 }
 0x238   :  { %1712 = vmatpush3.bf16.msra.mxu1 %v2012_v9 }
 0x239   :  { %1714 = vmatprep.subr.bf16.mxu1 %v2018_v11 }
 0x23c   :  { %1716 = vmatpush3.bf16.msra.mxu1 %v2018_v11 }
 0x241   :  { %v1740_v63 = vpop.eup %1739 }
 0x242   :  { %v919_v53 = vpop.xlane.xlu1 %918  ;;  %v328_v54 = vmul.f32 %v1740_v63, %v2081_v60 }
 0x243   :  { %v922_v55 = vmul.f32 0.0078125, %v919_v53 }
 0x244   :  { %v330_v56 = vmul.f32 %v2093_v2, %v328_v54 }
 0x245   :  { %v924_v33 = vadd.f32 1e-05, %v922_v55 }
 0x246   :  { %v332_v59 = vadd.f32 %v2099_v4, %v330_v56 }
 0x247   :  { %1741 = vrsqrt.f32 %v924_v33 }
 0x248   :  { %1284 = vmatmul.mubr.f32.vlgmr.msra.gmra.mrb[2].mxu0 %v332_v59 }
 0x249   :  { %1592 = vmatpush3.bf16.msra.mxu0 %v1921_v40 }
 0x24a   :  { %1594 = vmatprep.subr.bf16.mxu0 %v1926_v42 }
 0x24d   :  { %1596 = vmatpush3.bf16.msra.mxu0 %v1926_v42 }
 0x24e   :  { %1598 = vmatprep.subr.bf16.mxu0 %v1950_v52 }
 0x251   :  { %v1742_v19 = vpop.eup %1741  ;;  %1600 = vmatpush3.bf16.msra.mxu0 %v1950_v52 }
 0x252   :  { %v928_v60 = vmul.f32 %v1742_v19, %v2107_v43  ;;  %1602 = vmatprep.subr.bf16.mxu0 %v1962_v57 }
 0x254   :  { %v930_v0 = vmul.f32 %v2093_v2, %v928_v60 }
 0x255   :  { %1604 = vmatpush3.bf16.msra.mxu0 %v1962_v57 }
 0x256   :  { %v932_v1 = vadd.f32 %v2099_v4, %v930_v0  ;;  %1606 = vmatprep.subr.bf16.mxu0 %v1980_v62 }
 0x258   :  { %1458 = vmatprep.mubr.f32.mxu1 %v932_v1 }
 0x259   :  { %1608 = vmatpush3.bf16.msra.mxu0 %v1980_v62 }
 0x25a   :  { %1610 = vmatprep.subr.bf16.mxu0 %v1997_v3 }
 0x25d   :  { %1612 = vmatpush3.bf16.msra.mxu0 %v1997_v3 }
 0x25e   :  { %1614 = vmatprep.subr.bf16.mxu0 %v2012_v9 }
 0x261   :  { %1616 = vmatpush3.bf16.msra.mxu0 %v2012_v9 }
 0x262   :  { %1618 = vmatprep.subr.bf16.mxu0 %v2018_v11 }
 0x263   :  { %v560_v43 = vpop.xlane.xlu1 %559 }
 0x264   :  { %v563_v31 = vmul.f32 0.0078125, %v560_v43  ;;  %v921_v7 = vpop.xlane.xlu0 %920 }
 0x265   :  { %v923_v18 = vmul.f32 0.0078125, %v921_v7  ;;  %1620 = vmatpush3.bf16.msra.mxu0 %v2018_v11 }
 0x266   :  { %v565_v5 = vadd.f32 1e-05, %v563_v31  ;;  %1654 = vmatprep.subr.bf16.mxu0 %v1921_v40 }
 0x267   :  { %v925_v8 = vadd.f32 1e-05, %v923_v18 }
 0x268   :  { %1743 = vrsqrt.f32 %v565_v5 }
 0x269   :  { %1745 = vrsqrt.f32 %v925_v8 }
 0x26c   :  { %v562_v20 = vpop.xlane.xlu0 %561 }
 0x26d   :  { %v564_v24 = vmul.f32 0.0078125, %v562_v20 }
 0x26f   :  { %v566_v34 = vadd.f32 1e-05, %v564_v24 }
 0x271   :  { %1747 = vrsqrt.f32 %v566_v34 }
 0x272   :  { %v1744_v10 = vpop.eup %1743 }
 0x273   :  { %v1746_v12 = vpop.eup %1745  ;;  %v569_v13 = vmul.f32 %v1744_v10, %v2131_v37 }
 0x274   :  { %v929_v14 = vmul.f32 %v1746_v12, %v2134_v39 }
 0x275   :  { %v571_v15 = vmul.f32 %v2093_v2, %v569_v13 }
 0x276   :  { %v931_v16 = vmul.f32 %v2093_v2, %v929_v14 }
 0x277   :  { %v573_v22 = vadd.f32 %v2099_v4, %v571_v15 }
 0x278   :  { %v933_v47 = vadd.f32 %v2099_v4, %v931_v16 }
 0x279   :  { %1353 = vmatprep.mubr.f32.mxu0 %v573_v22 }
 0x27a   :  { %1459 = vmatmul.mubr.f32.vlgmr.msra.gmra.mrb[6].mxu1 %v933_v47 }
 0x27b   :  { %v1748_v58 = vpop.eup %1747 }
 0x27c   :  { %v570_v21 = vmul.f32 %v1748_v58, %v2141_v27 }
 0x27e   :  { %v572_v29 = vmul.f32 %v2093_v2, %v570_v21 }
 0x280   :  { %v574_v17 = vadd.f32 %v2099_v4, %v572_v29 }
 0x282   :  { %1354 = vmatmul.mubr.f32.vlgmr.msra.gmra.mrb[4].mxu0 %v574_v17 }
 0x283   :  { %1656 = vmatpush3.bf16.msra.mxu0 %v1921_v40 }
 0x284   :  { %v1250_v37 = vpop.f32.mrb[0].mxu1  ;;  %1658 = vmatprep.subr.bf16.mxu0 %v1926_v42 }
 0x285   :  { %286 = vrot.lane.b32.xlu0 %v1250_v37, %s1777_s19  ;;  %v273_v39 = vpop.f32.mrb[1].mxu1 }
 0x286   :  { %284 = vrot.lane.b32.xlu1 %v273_v39, %s1777_s19 }
 0x287   :  { %1660 = vmatpush3.bf16.msra.mxu0 %v1926_v42 }
 0x288   :  { %1662 = vmatprep.subr.bf16.mxu0 %v1950_v52 }
 0x28b   :  { %1664 = vmatpush3.bf16.msra.mxu0 %v1950_v52 }
 0x28c   :  { %1666 = vmatprep.subr.bf16.mxu0 %v1962_v57 }
 0x28f   :  { %1668 = vmatpush3.bf16.msra.mxu0 %v1962_v57 }
 0x290   :  { %1670 = vmatprep.subr.bf16.mxu0 %v1980_v62 }
 0x293   :  { %1672 = vmatpush3.bf16.msra.mxu0 %v1980_v62 }
 0x294   :  { %1674 = vmatprep.subr.bf16.mxu0 %v1997_v3 }
 0x297   :  { %1676 = vmatpush3.bf16.msra.mxu0 %v1997_v3 }
 0x298   :  { %1678 = vmatprep.subr.bf16.mxu0 %v2012_v9 }
 0x29b   :  { %1680 = vmatpush3.bf16.msra.mxu0 %v2012_v9 }
 0x29c   :  { %1682 = vmatprep.subr.bf16.mxu0 %v2018_v11 }
 0x29f   :  { %1684 = vmatpush3.bf16.msra.mxu0 %v2018_v11 }
 0x2a0   :  { %v802_v40 = vpop.xlane.xlu1 %801 }
 0x2a1   :  { %v805_v42 = vmul.f32 0.0078125, %v802_v40 }
 0x2a3   :  { %v807_v52 = vadd.f32 1e-05, %v805_v42 }
 0x2a5   :  { %1749 = vrsqrt.f32 %v807_v52 }
 0x2af   :  { %v1750_v57 = vpop.eup %1749 }
 0x2b0   :  { %v811_v27 = vmul.f32 %v1750_v57, %v2185_v25 }
 0x2b2   :  { %v813_v62 = vmul.f32 %v2093_v2, %v811_v27 }
 0x2b4   :  { %v815_v61 = vadd.f32 %v2099_v4, %v813_v62 }
 0x2b6   :  { %1423 = vmatprep.mubr.f32.mxu0 %v815_v61 }
 0x2bd   :  { %v1320_v3 = vpop.f32.mrb[2].mxu1 }
 0x2be   :  { %529 = vrot.lane.b32.xlu1 %v1320_v3, %s1777_s19  ;;  %v516_v9 = vpop.f32.mrb[3].mxu1 }
 0x2c2   :  { %v804_v32 = vpop.xlane.xlu0 %803  ;;  %527 = vrot.lane.b32.xlu1 %v516_v9, %s1777_s19 }
 0x2c3   :  { %v806_v11 = vmul.f32 0.0078125, %v804_v32 }
 0x2c5   :  { %v808_v35 = vadd.f32 1e-05, %v806_v11  ;;  %v1215_v49 = vpop.f32.mrb[0].mxu0 }
 0x2c6   :  { %166 = vst.msk [vmem:[#allocation2 + $0x20] sm:$0xff] %vm48_vm0, %v1215_v49  ;;  %v156_v36 = vpop.f32.mrb[1].mxu0 }
 0x2c7   :  { %1751 = vrsqrt.f32 %v808_v35  ;;  %165 = vst.msk [vmem:[#allocation2] sm:$0xff] %vm48_vm0, %v156_v36 }
 0x2d1   :  { %v1752_v25 = vpop.eup %1751 }
 0x2d2   :  { %v812_v41 = vmul.f32 %v1752_v25, %v2210_v28 }
 0x2d4   :  { %v814_v6 = vmul.f32 %v2093_v2, %v812_v41 }
 0x2d6   :  { %v816_v23 = vadd.f32 %v2099_v4, %v814_v6 }
 0x2d8   :  { %1424 = vmatmul.mubr.f32.vlgmr.msra.gmra.mrb[6].mxu0 %v816_v23 }
 0x2f2   :  { %v1390_v45 = vpop.f32.mrb[4].mxu1 }
 0x2f3   :  { %771 = vrot.lane.b32.xlu1 %v1390_v45, %s1777_s19  ;;  %v758_v38 = vpop.f32.mrb[5].mxu1 }
 0x2f4   :  { %769 = vrot.lane.b32.xlu0 %v758_v38, %s1777_s19 }
 0x2f7   :  { %v287_v46 = vpop.permute.xlu0 %286 }
 0x2f8   :  { %292 = vst.msk [vmem:[#allocation2 + $0x20] sm:$0xff] %vm290_vm1, %v287_v46  ;;  %v285_v44 = vpop.permute.xlu1 %284 }
 0x2f9   :  { %291 = vst.msk [vmem:[#allocation2] sm:$0xff] %vm290_vm1, %v285_v44 }
 0x31b   :  { %v1285_v48 = vpop.f32.mrb[2].mxu0 }
 0x31c   :  { %409 = vst.msk [vmem:[#allocation2 + $0x28] sm:$0xff] %vm48_vm0, %v1285_v48  ;;  %v399_v2 = vpop.f32.mrb[3].mxu0 }
 0x31d   :  { %408 = vst.msk [vmem:[#allocation2 + $0x8] sm:$0xff] %vm48_vm0, %v399_v2 }
 0x330   :  { %v530_v4 = vpop.permute.xlu1 %529 }
 0x331   :  { %534 = vst.msk [vmem:[#allocation2 + $0x28] sm:$0xff] %vm290_vm1, %v530_v4 }
 0x334   :  { %v528_v28 = vpop.permute.xlu1 %527 }
 0x335   :  { %533 = vst.msk [vmem:[#allocation2 + $0x8] sm:$0xff] %vm290_vm1, %v528_v28 }
 0x34d   :  { %v1460_v30 = vpop.f32.mrb[6].mxu1 }
 0x34e   :  { %1013 = vrot.lane.b32.xlu1 %v1460_v30, %s1777_s19  ;;  %v1000_v50 = vpop.f32.mrb[7].mxu1 }
 0x34f   :  { %1011 = vrot.lane.b32.xlu0 %v1000_v50, %s1777_s19  ;;  %s1753_s19 = scalar_lea.vmem %s1025_s2, 1024 }
 0x350   :  { %p1754_p0 = scmp.ne.s32.totalorder %s1025_s2, %s1753_s19  ;;  %p1759_p2 = scmp.lt.s32.totalorder %s1753_s19, %s1753_s19 }
 0x352   :  { %p1760_p3 = por %p1759_p2, %p1758_p1 }
 0x354   :  { %p1761_p4 = pnand %p1760_p3, %p1754_p0 }
 0x355   :  { %v1355_v26 = vpop.f32.mrb[4].mxu0 }
 0x356   :  { %651 = vst.msk [vmem:[#allocation2 + $0x30] sm:$0xff] %vm48_vm0, %v1355_v26  ;;  %v641_v51 = vpop.f32.mrb[5].mxu0 }
 0x357   :  { %650 = vst.msk [vmem:[#allocation2 + $0x10] sm:$0xff] %vm48_vm0, %v641_v51 }
 0x365   :  { %v772_v63 = vpop.permute.xlu1 %771 }
 0x366   :  { %776 = vst.msk [vmem:[#allocation2 + $0x30] sm:$0xff] %vm290_vm1, %v772_v63  ;;  %v770_v53 = vpop.permute.xlu0 %769 }
 0x367   :  { %775 = vst.msk [vmem:[#allocation2 + $0x10] sm:$0xff] %vm290_vm1, %v770_v53 }
 0x3ab   :  { %v1425_v54 = vpop.f32.mrb[6].mxu0 }
 0x3ac   :  { %893 = vst.msk [vmem:[#allocation2 + $0x38] sm:$0xff] %vm48_vm0, %v1425_v54  ;;  %v883_v55 = vpop.f32.mrb[7].mxu0 }
 0x3ad   :  { %892 = vst.msk [vmem:[#allocation2 + $0x18] sm:$0xff] %vm48_vm0, %v883_v55 }
 0x3c0   :  { %v1014_v56 = vpop.permute.xlu1 %1013 }
 0x3c1   :  { %1018 = vst.msk [vmem:[#allocation2 + $0x38] sm:$0xff] %vm290_vm1, %v1014_v56  ;;  %v1012_v33 = vpop.permute.xlu0 %1011 }
 0x3c2   :  { %1017 = vst.msk [vmem:[#allocation2 + $0x18] sm:$0xff] %vm290_vm1, %v1012_v33 }
 0x3c3   :  { %1764 = shalt.err (!%p1761_p4)
}
 0x3c4   :  { %s1765_s8 = scalar_lea.hbm %s2312_s4, 1024 }
 0x3c5   :  { %p1766_p5 = scmp.ne.s32.totalorder %s2312_s4, %s1765_s8  ;;  %p1769_p6 = scmp.lt.u32.totalorder %s1765_s8, %s2312_s4 }
 0x3c7   :  { %p1771_p7 = pnand %p1769_p6, %p1766_p5 }
 0x3c9   :  { %1774 = shalt.err (!%p1771_p7)
}
 0x3ca   :  { %s1779_s13 = smov 512   ;;  %s1780_s14 = smov 32  }
 0x3cb   :  { %1030 = dma.vmem_to_hbm [thread:$0]  %s1025_s2, 1024, %s2312_s4, [#allocation3], %s1779_s13, %s1779_s13, %s1780_s14  }
 0x3cc   :  { %1775 = dma.done.wait [#allocation3], 1024  }
 0x3cd   :  { %1776 = vsyncadd [#allocation3], 4294966272 }
 0x3ce   :  { %1034 = vsyncpa [#allocation3], 1 }

</bundles_post_ra>
